<compile_context>
chip_gen: v7x
topology: tpu7x:2x2x1
jax: 0.10.0
libtpu: 0.0.40
codegen_flags: <defaults>
</compile_context>

<pallas_src>
import functools

import jax
import jax.numpy as jnp
import numpy as np
from jax.experimental import pallas as pl
from jax.experimental.pallas import tpu as pltpu

_MAX_TILE_C = 8192   # lanes per class chunk (multiple of 128)
_MAX_TILE_N = 1024   # rows per row tile (>= 512 rows is ~85%+ of HBM roofline)


def _wce_kernel(logits_ref, target_ref, sample_w_ref, out_ref,
                m_sc, s_sc, sel_sc, *, num_classes, tile_c):
    """One (tile_n, tile_c) logits chunk: online log-sum-exp + raw target-logit accumulation."""
    k = pl.program_id(1)

    @pl.when(k == 0)
    def _init():
        m_sc[...] = jnp.full(m_sc.shape, -1e30, m_sc.dtype)
        s_sc[...] = jnp.zeros(s_sc.shape, s_sc.dtype)
        sel_sc[...] = jnp.zeros(sel_sc.shape, sel_sc.dtype)

    x = logits_ref[...]                                    # (TN, TC) native dtype
    tgt = target_ref[...]                                  # (TN, 1) int32

    # Global class index of every lane in this chunk.
    col = jax.lax.broadcasted_iota(jnp.int32, x.shape, 1) + k * tile_c
    if num_classes % tile_c != 0:
        # Ragged last class chunk: neutralize the out-of-range lanes (stale VMEM data there).
        x = jnp.where(col < num_classes, x, jnp.asarray(jnp.finfo(x.dtype).min, x.dtype))

    # Raw selected logit for this chunk (the target lane lives in exactly one chunk).
    # Independent of the max, so the VPU select overlaps the XLU max reduction.
    sel_blk = jnp.sum(jnp.where(col == tgt, x, jnp.zeros((), x.dtype)),
                      axis=-1, keepdims=True).astype(jnp.float32)       # (TN, 1)
    m_blk = jnp.max(x, axis=-1, keepdims=True).astype(jnp.float32)      # (TN, 1)

    m_old = m_sc[...]
    m_new = jnp.maximum(m_old, m_blk)
    e = jnp.exp(x.astype(jnp.float32) - m_new)                          # (TN, TC) f32
    s_sc[...] = s_sc[...] * jnp.exp(m_old - m_new) + jnp.sum(e, axis=-1, keepdims=True)
    m_sc[...] = m_new
    sel_sc[...] = sel_sc[...] + sel_blk

    @pl.when(k == pl.num_programs(1) - 1)
    def _finalize():
        w = sample_w_ref[...]                                           # (TN, 1) f32
        # -w * log_softmax(x)[t] = w * (m + log(sum(exp(x - m))) - x[t])
        out_ref[...] = (w * (m_sc[...] + jnp.log(s_sc[...]) - sel_sc[...])
                        ).astype(out_ref.dtype)


def _vmem_limit_bytes():
    """Generation-aware VMEM grant: 3/4 of physical per-core VMEM, capped at 96 MiB."""
    try:
        phys = int(getattr(pltpu.get_tpu_info(), "vmem_capacity_bytes", 0))
    except Exception:
        phys = 0
    if phys <= 0:
        phys = 64 * 2**20          # conservative default (v7x per-TensorCore)
    return min((phys * 3) // 4, 96 * 2**20)


def _choose_tiles(n, c, itemsize, sublane_mult, vmem_bytes):
    """Pick (tile_n, tile_c) against the VMEM budget; no divisibility requirement on n or c."""
    tile_c = c if c <= _MAX_TILE_C else _MAX_TILE_C

    # Per-row VMEM: double-buffered logits slice + ~3 live full-width 32-bit temps
    # (iota, f32 exp argument/result), plus the 128-lane-padded (TN, 1) columns
    # (target / weight / out double-buffered + 3 f32 scratch accumulators).
    row_bytes = 2 * tile_c * itemsize + 3 * tile_c * 4 + (3 * 2 + 3) * 128 * 4
    cap = int((vmem_bytes - 2 * 2**20) // row_bytes)
    cap = min(max(cap, sublane_mult), _MAX_TILE_N)
    cap -= cap % sublane_mult

    if n <= cap:
        tile_n = n                  # one tile; a full-dim block is always layout-legal
        if n >= 2 * 512:            # keep v7x's 2nd TensorCore busy (>= 2 parallel row steps)
            half = -(-n // 2)
            tile_n = ((half + sublane_mult - 1) // sublane_mult) * sublane_mult
    else:
        tile_n = cap                # ragged last row tile handled by Pallas partial blocks
    return tile_n, tile_c


def weighted_cross_entropy(logits, target, class_weights, *, tile_n=None, tile_c=None):
    """logits (N, C) f32/bf16/f16, target (N,) int, class_weights (C,) -> (N,) f32 loss."""
    n, c = logits.shape
    itemsize = jnp.dtype(logits.dtype).itemsize
    sublane_mult = {4: 8, 2: 16, 1: 32}.get(itemsize, 8)

    vmem_bytes = _vmem_limit_bytes()
    auto_n, auto_c = _choose_tiles(n, c, itemsize, sublane_mult, vmem_bytes)
    tile_n = auto_n if tile_n is None else tile_n
    tile_c = auto_c if tile_c is None else tile_c
    assert tile_n == n or tile_n % sublane_mult == 0, "tile_n must respect sublane tiling"
    assert tile_c == c or tile_c % 128 == 0, "tile_c must be a multiple of 128 (or full C)"

    # O(N) per-sample weight gather stays in XLA; the kernel streams only the (N, C) logits.
    sample_w = class_weights.astype(jnp.float32)[target].reshape(n, 1)
    tgt = target.astype(jnp.int32).reshape(n, 1)

    grid = (pl.cdiv(n, tile_n), pl.cdiv(c, tile_c))
    kernel = functools.partial(_wce_kernel, num_classes=c, tile_c=tile_c)

    out = pl.pallas_call(
        kernel,
        out_shape=jax.ShapeDtypeStruct((n, 1), jnp.float32),
        grid_spec=pltpu.PrefetchScalarGridSpec(
            num_scalar_prefetch=0,
            grid=grid,
            in_specs=[
                pl.BlockSpec((tile_n, tile_c), lambda i, k: (i, k)),   # logits chunk
                pl.BlockSpec((tile_n, 1), lambda i, k: (i, 0)),        # targets (column)
                pl.BlockSpec((tile_n, 1), lambda i, k: (i, 0)),        # per-sample weights
            ],
            out_specs=pl.BlockSpec((tile_n, 1), lambda i, k: (i, 0)),
            scratch_shapes=[pltpu.VMEM((tile_n, 1), jnp.float32)] * 3,  # m, sumexp, sel
        ),
        compiler_params=pltpu.CompilerParams(
            dimension_semantics=("parallel", "arbitrary"),
            vmem_limit_bytes=vmem_bytes,
        ),
    )(logits, tgt, sample_w)
    return out.reshape(n)


if __name__ == "__main__":
    key = jax.random.PRNGKey(0)
    k1, k2, k3 = jax.random.split(key, 3)

    def ref_loss(lg, tg, cw):
        logp = jax.nn.log_softmax(lg.astype(jnp.float32), axis=1)
        return -cw.astype(jnp.float32)[tg] * logp[jnp.arange(lg.shape[0]), tg]

    N, C = 48, 32
    logits = jax.random.normal(k1, (N, C), dtype=jnp.float32)
    target = jax.random.randint(k2, (N,), 0, C, dtype=jnp.int32)
    class_weights = jnp.linspace(0.5, 2.0, C, dtype=jnp.float32)
    ref = ref_loss(logits, target, class_weights)

    # 1) auto tiles: single row tile, single class chunk
    out = jax.block_until_ready(weighted_cross_entropy(logits, target, class_weights))
    np.testing.assert_allclose(np.asarray(out), np.asarray(ref), rtol=1e-5, atol=1e-5)

    # 2) forced small row tile -> multi-step row grid
    out2 = jax.block_until_ready(
        weighted_cross_entropy(logits, target, class_weights, tile_n=16))
    np.testing.assert_allclose(np.asarray(out2), np.asarray(ref), rtol=1e-5, atol=1e-5)

    # 3) ragged batch (N not a multiple of tile_n): partial last row block, no logits pad
    out3 = jax.block_until_ready(
        weighted_cross_entropy(logits[:20], target[:20], class_weights, tile_n=16))
    np.testing.assert_allclose(np.asarray(out3), np.asarray(ref[:20]), rtol=1e-5, atol=1e-5)

    # 4) class-chunked path (C=200, tile_c=128): online LSE + masked ragged class chunk
    C2 = 200
    logits2 = jax.random.normal(k3, (N, C2), dtype=jnp.float32)
    target2 = jax.random.randint(k2, (N,), 0, C2, dtype=jnp.int32)
    cw2 = jnp.linspace(0.25, 1.75, C2, dtype=jnp.float32)
    ref2 = ref_loss(logits2, target2, cw2)
    out4 = jax.block_until_ready(
        weighted_cross_entropy(logits2, target2, cw2, tile_n=16, tile_c=128))
    np.testing.assert_allclose(np.asarray(out4), np.asarray(ref2), rtol=1e-5, atol=1e-5)

    # 5) bf16 logits: native-dtype max/select, f32 exp/accumulation
    logits_bf = logits.astype(jnp.bfloat16)
    ref_bf = ref_loss(logits_bf, target, class_weights)
    out5 = jax.block_until_ready(
        weighted_cross_entropy(logits_bf, target, class_weights))
    np.testing.assert_allclose(np.asarray(out5), np.asarray(ref_bf), rtol=1e-5, atol=1e-5)

    print("KERNEL_OK")
</pallas_src>

<mosaic_0001>
module attributes {stable_mosaic.version = 11 : i64} {
  func.func @_wce_kernel(%arg0: i32, %arg1: i32, %arg2: memref<48x32xf32, #tpu.memory_space<vmem>>, %arg3: memref<48x1xi32, #tpu.memory_space<vmem>>, %arg4: memref<48x1xf32, #tpu.memory_space<vmem>>, %arg5: memref<48x1xf32, #tpu.memory_space<vmem>>, %arg6: memref<48x1xf32, #tpu.memory_space<vmem>>, %arg7: memref<48x1xf32, #tpu.memory_space<vmem>>, %arg8: memref<48x1xf32, #tpu.memory_space<vmem>>) attributes {dimension_semantics = [#tpu.dimension_semantics<parallel>, #tpu.dimension_semantics<arbitrary>], iteration_bounds = array<i64: 1, 1>, scalar_prefetch = 0 : i64, scratch_operands = 3 : i64, tpu.core_type = #tpu.core_type<tc>, window_params = [{transform_indices = @transform_0, window_bounds = array<i64: 48, 32>}, {transform_indices = @transform_1, window_bounds = array<i64: 48, 1>}, {transform_indices = @transform_2, window_bounds = array<i64: 48, 1>}, {transform_indices = @transform_3, window_bounds = array<i64: 48, 1>}]} {
    %c0_i32 = arith.constant 0 : i32
    %0 = arith.cmpi eq, %arg1, %c0_i32 : i32
    %1 = arith.extui %0 : i1 to i32
    %c0_i32_0 = arith.constant 0 : i32
    %2 = arith.cmpi ne, %1, %c0_i32_0 : i32
    scf.if %2 {
      %cst_21 = arith.constant -1.000000e+30 : f32
      %37 = vector.broadcast %cst_21 : f32 to vector<48x1xf32>
      %c0_22 = arith.constant 0 : index
      %c0_23 = arith.constant 0 : index
      %38 = vector.load %arg6[%c0_22, %c0_23] : memref<48x1xf32, #tpu.memory_space<vmem>>, vector<48x1xf32>
      tpu.vector_store %arg6[%c0_22, %c0_23], %37 {strides = array<i32>} : memref<48x1xf32, #tpu.memory_space<vmem>>, vector<48x1xf32>,
      %cst_24 = arith.constant 0.000000e+00 : f32
      %39 = vector.broadcast %cst_24 : f32 to vector<48x1xf32>
      %c0_25 = arith.constant 0 : index
      %c0_26 = arith.constant 0 : index
      %40 = vector.load %arg7[%c0_25, %c0_26] : memref<48x1xf32, #tpu.memory_space<vmem>>, vector<48x1xf32>
      tpu.vector_store %arg7[%c0_25, %c0_26], %39 {strides = array<i32>} : memref<48x1xf32, #tpu.memory_space<vmem>>, vector<48x1xf32>,
      %cst_27 = arith.constant 0.000000e+00 : f32
      %41 = vector.broadcast %cst_27 : f32 to vector<48x1xf32>
      %c0_28 = arith.constant 0 : index
      %c0_29 = arith.constant 0 : index
      %42 = vector.load %arg8[%c0_28, %c0_29] : memref<48x1xf32, #tpu.memory_space<vmem>>, vector<48x1xf32>
      tpu.vector_store %arg8[%c0_28, %c0_29], %41 {strides = array<i32>} : memref<48x1xf32, #tpu.memory_space<vmem>>, vector<48x1xf32>,
    } else {
    }
    %c0 = arith.constant 0 : index
    %c0_1 = arith.constant 0 : index
    %3 = vector.load %arg2[%c0, %c0_1] : memref<48x32xf32, #tpu.memory_space<vmem>>, vector<48x32xf32>
    %c0_2 = arith.constant 0 : index
    %c0_3 = arith.constant 0 : index
    %4 = vector.load %arg3[%c0_2, %c0_3] : memref<48x1xi32, #tpu.memory_space<vmem>>, vector<48x1xi32>
    %5 = tpu.iota {dimensions = array<i32: 1>} : vector<48x32xi32>
    %c32_i32 = arith.constant 32 : i32
    %6 = arith.muli %arg1, %c32_i32 : i32
    %7 = vector.broadcast %6 : i32 to vector<48x32xi32>
    %8 = arith.addi %5, %7 : vector<48x32xi32>
    %9 = vector.broadcast %4 : vector<48x1xi32> to vector<48x32xi32>
    %10 = arith.cmpi eq, %8, %9 : vector<48x32xi32>
    %cst = arith.constant 0.000000e+00 : f32
    %11 = vector.broadcast %cst : f32 to vector<48x32xf32>
    %12 = arith.select %10, %3, %11 : vector<48x32xi1>, vector<48x32xf32>
    %cst_4 = arith.constant dense<0.000000e+00> : vector<48xf32>
    %13 = vector.multi_reduction <add>, %12, %cst_4 [1] : vector<48x32xf32> to vector<48xf32>
    %14 = vector.shape_cast %13 : vector<48xf32> to vector<48x1xf32>
    %cst_5 = arith.constant dense<0xFF800000> : vector<48xf32>
    %15 = vector.multi_reduction <maximumf>, %3, %cst_5 [1] : vector<48x32xf32> to vector<48xf32>
    %16 = vector.shape_cast %15 : vector<48xf32> to vector<48x1xf32>
    %c0_6 = arith.constant 0 : index
    %c0_7 = arith.constant 0 : index
    %17 = vector.load %arg6[%c0_6, %c0_7] : memref<48x1xf32, #tpu.memory_space<vmem>>, vector<48x1xf32>
    %18 = arith.maximumf %17, %16 : vector<48x1xf32>
    %19 = vector.broadcast %18 : vector<48x1xf32> to vector<48x32xf32>
    %20 = arith.subf %3, %19 : vector<48x32xf32>
    %21 = math.exp %20 : vector<48x32xf32>
    %c0_8 = arith.constant 0 : index
    %c0_9 = arith.constant 0 : index
    %22 = vector.load %arg7[%c0_8, %c0_9] : memref<48x1xf32, #tpu.memory_space<vmem>>, vector<48x1xf32>
    %23 = arith.subf %17, %18 : vector<48x1xf32>
    %24 = math.exp %23 : vector<48x1xf32>
    %25 = arith.mulf %22, %24 : vector<48x1xf32>
    %cst_10 = arith.constant dense<0.000000e+00> : vector<48xf32>
    %26 = vector.multi_reduction <add>, %21, %cst_10 [1] : vector<48x32xf32> to vector<48xf32>
    %27 = vector.shape_cast %26 : vector<48xf32> to vector<48x1xf32>
    %28 = arith.addf %25, %27 : vector<48x1xf32>
    %c0_11 = arith.constant 0 : index
    %c0_12 = arith.constant 0 : index
    %29 = vector.load %arg7[%c0_11, %c0_12] : memref<48x1xf32, #tpu.memory_space<vmem>>, vector<48x1xf32>
    tpu.vector_store %arg7[%c0_11, %c0_12], %28 {strides = array<i32>} : memref<48x1xf32, #tpu.memory_space<vmem>>, vector<48x1xf32>,
    %c0_13 = arith.constant 0 : index
    %c0_14 = arith.constant 0 : index
    %30 = vector.load %arg6[%c0_13, %c0_14] : memref<48x1xf32, #tpu.memory_space<vmem>>, vector<48x1xf32>
    tpu.vector_store %arg6[%c0_13, %c0_14], %18 {strides = array<i32>} : memref<48x1xf32, #tpu.memory_space<vmem>>, vector<48x1xf32>,
    %c0_15 = arith.constant 0 : index
    %c0_16 = arith.constant 0 : index
    %31 = vector.load %arg8[%c0_15, %c0_16] : memref<48x1xf32, #tpu.memory_space<vmem>>, vector<48x1xf32>
    %32 = arith.addf %31, %14 : vector<48x1xf32>
    %c0_17 = arith.constant 0 : index
    %c0_18 = arith.constant 0 : index
    %33 = vector.load %arg8[%c0_17, %c0_18] : memref<48x1xf32, #tpu.memory_space<vmem>>, vector<48x1xf32>
    tpu.vector_store %arg8[%c0_17, %c0_18], %32 {strides = array<i32>} : memref<48x1xf32, #tpu.memory_space<vmem>>, vector<48x1xf32>,
    %c0_i32_19 = arith.constant 0 : i32
    %34 = arith.cmpi eq, %arg1, %c0_i32_19 : i32
    %35 = arith.extui %34 : i1 to i32
    %c0_i32_20 = arith.constant 0 : i32
    %36 = arith.cmpi ne, %35, %c0_i32_20 : i32
    scf.if %36 {
      %c0_21 = arith.constant 0 : index
      %c0_22 = arith.constant 0 : index
      %37 = vector.load %arg4[%c0_21, %c0_22] : memref<48x1xf32, #tpu.memory_space<vmem>>, vector<48x1xf32>
      %c0_23 = arith.constant 0 : index
      %c0_24 = arith.constant 0 : index
      %38 = vector.load %arg6[%c0_23, %c0_24] : memref<48x1xf32, #tpu.memory_space<vmem>>, vector<48x1xf32>
      %c0_25 = arith.constant 0 : index
      %c0_26 = arith.constant 0 : index
      %39 = vector.load %arg7[%c0_25, %c0_26] : memref<48x1xf32, #tpu.memory_space<vmem>>, vector<48x1xf32>
      %40 = math.log %39 : vector<48x1xf32>
      %41 = arith.addf %38, %40 : vector<48x1xf32>
      %c0_27 = arith.constant 0 : index
      %c0_28 = arith.constant 0 : index
      %42 = vector.load %arg8[%c0_27, %c0_28] : memref<48x1xf32, #tpu.memory_space<vmem>>, vector<48x1xf32>
      %43 = arith.subf %41, %42 : vector<48x1xf32>
      %44 = arith.mulf %37, %43 : vector<48x1xf32>
      %c0_29 = arith.constant 0 : index
      %c0_30 = arith.constant 0 : index
      %45 = vector.load %arg5[%c0_29, %c0_30] : memref<48x1xf32, #tpu.memory_space<vmem>>, vector<48x1xf32>
      tpu.vector_store %arg5[%c0_29, %c0_30], %44 {strides = array<i32>} : memref<48x1xf32, #tpu.memory_space<vmem>>, vector<48x1xf32>,
    } else {
    }
    return
  }
  func.func @transform_0(%arg0: i32, %arg1: i32) -> (i32, i32) {
    %c0_i32 = arith.constant 0 : i32
    return %arg0, %arg1 : i32, i32
  }
  func.func @transform_1(%arg0: i32, %arg1: i32) -> (i32, i32) {
    %c0_i32 = arith.constant 0 : i32
    %c0_i32_0 = arith.constant 0 : i32
    return %arg0, %c0_i32 : i32, i32
  }
  func.func @transform_2(%arg0: i32, %arg1: i32) -> (i32, i32) {
    %c0_i32 = arith.constant 0 : i32
    %c0_i32_0 = arith.constant 0 : i32
    return %arg0, %c0_i32 : i32, i32
  }
  func.func @transform_3(%arg0: i32, %arg1: i32) -> (i32, i32) {
    %c0_i32 = arith.constant 0 : i32
    %c0_i32_0 = arith.constant 0 : i32
    return %arg0, %c0_i32 : i32, i32
  }
}

</mosaic_0001>

<bundles_post_ra>
// kernel: tpu_custom_call.1
= control target key start
LH: loop header
LB: loop body
LE: loop exit
PB: predicated region body
PF: predicated region fallthrough
CT: control target
= control target key end

     0   :  { %vm84_vm0 = vcmask 261120   ;;  %vm18_vm1 = vcmask 7168   ;;  %v374_v3 = vmov -1e+30   ;;  %v375_v13 = vmov 0   ;;  %s631_s0 = inlined_call_operand.vmem [shape: f32[48,32], index: 0, kind: input, shape index: {}]   ;;  %s632_s1 = inlined_call_operand.vmem [shape: s32[48,1], index: 1, kind: input, shape index: {}]   ;;  %s633_s2 = inlined_call_operand.vmem [shape: f32[48,1], index: 2, kind: input, shape index: {}]   ;;  %s634_s3 = inlined_call_operand.vmem [shape: f32[48,1], index: 3, kind: output, shape index: {}]  }
   0x1   :  { %v400_v0 = vld [vmem:[%s631_s0] sm:$0xff]  ;;  %v405_v1 = vld [vmem:[%s631_s0 + $0x8] sm:$0xff]  ;;  %v410_v2 = vld [vmem:[%s631_s0 + $0x10] sm:$0xff]  ;;  %19 = vst.msk [vmem:[#allocation2] sm:$0xff] %vm18_vm1, %v374_v3  ;;  %336 = vset.pattern.permute.xlu0 %v375_v13  ;;  %337 = vset.pattern.permute.xlu1 %v375_v13  ;;  %v376_v14 = vmov 0.0  }
   0x2   :  { %20 = vst.msk [vmem:[#allocation2 + $0x8] sm:$0xff] %vm18_vm1, %v374_v3  ;;  %21 = vst.msk [vmem:[#allocation2 + $0x10] sm:$0xff] %vm18_vm1, %v374_v3  ;;  %v103_v4 = vsel %vm84_vm0, %v400_v0, -inf  ;;  %v109_v5 = vsel %vm84_vm0, %v410_v2, -inf  ;;  %v425_v6 = vld [vmem:[%s631_s0 + $0x18] sm:$0xff]  ;;  %v106_v7 = vsel %vm84_vm0, %v405_v1, -inf }
   0x3   :  { %22 = vst.msk [vmem:[#allocation2 + $0x18] sm:$0xff] %vm18_vm1, %v374_v3  ;;  %23 = vst.msk [vmem:[#allocation2 + $0x20] sm:$0xff] %vm18_vm1, %v374_v3  ;;  %104 = vmax.xlane.f32.xlu0 %v103_v4  ;;  %110 = vmax.xlane.f32.xlu1 %v109_v5  ;;  %v112_v8 = vsel %vm84_vm0, %v425_v6, -inf  ;;  %v434_v9 = vld [vmem:[%s631_s0 + $0x20] sm:$0xff]  ;;  %v439_v10 = vld [vmem:[%s631_s0 + $0x28] sm:$0xff] }
   0x4   :  { %24 = vst.msk [vmem:[#allocation2 + $0x28] sm:$0xff] %vm18_vm1, %v374_v3  ;;  %v115_v11 = vsel %vm84_vm0, %v434_v9, -inf  ;;  %v118_v12 = vsel %vm84_vm0, %v439_v10, -inf  ;;  %25 = vst.msk [vmem:[#allocation3] sm:$0xff] %vm18_vm1, %v376_v14  ;;  %v46_v26 = vld [vmem:[%s632_s1 + $0x18] sm:$0xff]  ;;  %v48_v34 = vld [vmem:[%s632_s1 + $0x28] sm:$0xff] }
   0x5   :  { %26 = vst.msk [vmem:[#allocation3 + $0x8] sm:$0xff] %vm18_vm1, %v376_v14  ;;  %27 = vst.msk [vmem:[#allocation3 + $0x10] sm:$0xff] %vm18_vm1, %v376_v14  ;;  %v43_v41 = vld [vmem:[%s632_s1] sm:$0xff]  ;;  %v44_v42 = vld [vmem:[%s632_s1 + $0x8] sm:$0xff] }
   0x6   :  { %28 = vst.msk [vmem:[#allocation3 + $0x18] sm:$0xff] %vm18_vm1, %v376_v14  ;;  %29 = vst.msk [vmem:[#allocation3 + $0x20] sm:$0xff] %vm18_vm1, %v376_v14  ;;  %v45_v43 = vld [vmem:[%s632_s1 + $0x10] sm:$0xff]  ;;  %v47_v44 = vld [vmem:[%s632_s1 + $0x20] sm:$0xff] }
   0x7   :  { %107 = vmax.xlane.f32.xlu0 %v106_v7  ;;  %113 = vmax.xlane.f32.xlu1 %v112_v8  ;;  %30 = vst.msk [vmem:[#allocation3 + $0x28] sm:$0xff] %vm18_vm1, %v376_v14  ;;  %31 = vst.msk [vmem:[#allocation4] sm:$0xff] %vm18_vm1, %v376_v14  ;;  %v49_v8 = vlaneseq }
   0x8   :  { %32 = vst.msk [vmem:[#allocation4 + $0x8] sm:$0xff] %vm18_vm1, %v376_v14  ;;  %33 = vst.msk [vmem:[#allocation4 + $0x10] sm:$0xff] %vm18_vm1, %v376_v14  ;;  %v457_v15 = vld [vmem:[#allocation2] sm:$0xff] }
   0x9   :  { %34 = vst.msk [vmem:[#allocation4 + $0x18] sm:$0xff] %vm18_vm1, %v376_v14  ;;  %35 = vst.msk [vmem:[#allocation4 + $0x20] sm:$0xff] %vm18_vm1, %v376_v14  ;;  %v459_v16 = vld [vmem:[#allocation2 + $0x10] sm:$0xff]  ;;  %v467_v21 = vld [vmem:[#allocation2 + $0x8] sm:$0xff] }
   0xa   :  { %36 = vst.msk [vmem:[#allocation4 + $0x28] sm:$0xff] %vm18_vm1, %v376_v14  ;;  %v469_v22 = vld [vmem:[#allocation2 + $0x18] sm:$0xff]  ;;  %v489_v30 = vld [vmem:[#allocation2 + $0x20] sm:$0xff]  ;;  %v50_v14 = vand.u32 127, %v49_v8 }
   0xb   :  { %116 = vmax.xlane.f32.xlu0 %v115_v11  ;;  %119 = vmax.xlane.f32.xlu1 %v118_v12  ;;  %v491_v31 = vld [vmem:[#allocation2 + $0x28] sm:$0xff] }
  0x90   :  { %v105_v17 = vpop.xlane.xlu0 %104  ;;  %v111_v18 = vpop.xlane.xlu1 %110 }
  0x91   :  { %v462_v19 = vmax.f32 %v457_v15, %v105_v17  ;;  %v465_v20 = vmax.f32 %v459_v16, %v111_v18 }
  0x93   :  { %v187_v23 = vsub.f32 %v457_v15, %v462_v19  ;;  %242 = vst.msk [vmem:[#allocation2] sm:$0xff] %vm18_vm1, %v462_v19  ;;  %135 = vperm.xlu0 %336, %v462_v19   ;;  %v189_v24 = vsub.f32 %v459_v16, %v465_v20  ;;  %244 = vst.msk [vmem:[#allocation2 + $0x10] sm:$0xff] %vm18_vm1, %v465_v20 }
  0x94   :  { %v108_v25 = vpop.xlane.xlu0 %107  ;;  %v114_v27 = vpop.xlane.xlu1 %113 }
  0x95   :  { %v484_v28 = vmax.f32 %v467_v21, %v108_v25  ;;  %v487_v29 = vmax.f32 %v469_v22, %v114_v27 }
  0x97   :  { %v188_v32 = vsub.f32 %v467_v21, %v484_v28  ;;  %243 = vst.msk [vmem:[#allocation2 + $0x8] sm:$0xff] %vm18_vm1, %v484_v28  ;;  %140 = vperm.xlu1 %337, %v484_v28   ;;  %64 = vperm.xlu0 %336, %v46_v26   ;;  %v190_v33 = vsub.f32 %v469_v22, %v487_v29  ;;  %245 = vst.msk [vmem:[#allocation2 + $0x18] sm:$0xff] %vm18_vm1, %v487_v29  ;;  %v182_v28 = vld [vmem:[#allocation3 + $0x8] sm:$0xff] }
  0x98   :  { %v117_v35 = vpop.xlane.xlu0 %116  ;;  %v120_v36 = vpop.xlane.xlu1 %119 }
  0x99   :  { %v506_v37 = vmax.f32 %v489_v30, %v117_v35  ;;  %v509_v38 = vmax.f32 %v491_v31, %v120_v36 }
  0x9b   :  { %145 = vperm.xlu1 %337, %v465_v20   ;;  %70 = vperm.xlu0 %336, %v48_v34   ;;  %v191_v39 = vsub.f32 %v489_v30, %v506_v37  ;;  %246 = vst.msk [vmem:[#allocation2 + $0x20] sm:$0xff] %vm18_vm1, %v506_v37  ;;  %v192_v40 = vsub.f32 %v491_v31, %v509_v38  ;;  %247 = vst.msk [vmem:[#allocation2 + $0x28] sm:$0xff] %vm18_vm1, %v509_v38 }
  0x9d   :  { %v201_v15 = vmul.f32 1.442695, %v191_v39  ;;  %v203_v16 = vmul.f32 1.442695, %v192_v40 }
  0x9f   :  { %150 = vperm.xlu1 %337, %v487_v29   ;;  %v183_v29 = vld [vmem:[#allocation3 + $0x10] sm:$0xff] }
  0xa3   :  { %155 = vperm.xlu1 %337, %v506_v37  }
  0xa7   :  { %160 = vperm.xlu1 %337, %v509_v38  }
  0xab   :  { %55 = vperm.xlu1 %337, %v43_v41  }
  0xaf   :  { %58 = vperm.xlu1 %337, %v44_v42  }
  0xb3   :  { %61 = vperm.xlu1 %337, %v45_v43  }
  0xb7   :  { %67 = vperm.xlu1 %337, %v47_v44  }
 0x112   :  { %v136_v45 = vpop.permute.xlu0 %135 }
 0x113   :  { %v163_v46 = vsub.f32 %v400_v0, %v136_v45 }
 0x115   :  { %v169_v47 = vmul.f32 1.442695, %v163_v46 }
 0x116   :  { %v141_v48 = vpop.permute.xlu1 %140  ;;  %v65_v34 = vpop.permute.xlu0 %64 }
 0x117   :  { %338 = vpow2.f32 %v169_v47  ;;  %v164_v49 = vsub.f32 %v405_v1, %v141_v48  ;;  %vm75_vm5 = vcmp.eq.s32.totalorder %v50_v14, %v65_v34 }
 0x119   :  { %v171_v50 = vmul.f32 1.442695, %v164_v49  ;;  %v81_v49 = vsel %vm75_vm5, %v425_v6, 0.0 }
 0x11a   :  { %v146_v51 = vpop.permute.xlu1 %145  ;;  %v71_v46 = vpop.permute.xlu0 %70 }
 0x11b   :  { %340 = vpow2.f32 %v171_v50  ;;  %v165_v52 = vsub.f32 %v410_v2, %v146_v51  ;;  %vm77_vm7 = vcmp.eq.s32.totalorder %v50_v14, %v71_v46  ;;  %v275_v46 = vld [vmem:[#allocation2] sm:$0xff] }
 0x11d   :  { %v173_v53 = vmul.f32 1.442695, %v165_v52  ;;  %v193_v52 = vmul.f32 1.442695, %v187_v23 }
 0x11e   :  { %v151_v54 = vpop.permute.xlu1 %150 }
 0x11f   :  { %342 = vpow2.f32 %v173_v53  ;;  %v166_v55 = vsub.f32 %v425_v6, %v151_v54  ;;  %v195_v6 = vmul.f32 1.442695, %v188_v32  ;;  %v181_v54 = vld [vmem:[#allocation3] sm:$0xff] }
 0x121   :  { %v339_v56 = vpop.eup %338  ;;  %v175_v57 = vmul.f32 1.442695, %v166_v55  ;;  %v184_v55 = vld [vmem:[#allocation3 + $0x18] sm:$0xff] }
 0x122   :  { %v156_v58 = vpop.permute.xlu1 %155  ;;  %v211_v59 = vsel %vm84_vm0, %v339_v56, 0.0 }
 0x123   :  { %344 = vpow2.f32 %v175_v57  ;;  %v167_v60 = vsub.f32 %v434_v9, %v156_v58  ;;  %212 = vadd.xlane.f32.xlu1 %v211_v59  ;;  %v185_v58 = vld [vmem:[#allocation3 + $0x20] sm:$0xff] }
 0x125   :  { %v341_v61 = vpop.eup %340  ;;  %v177_v62 = vmul.f32 1.442695, %v167_v60 }
 0x126   :  { %v161_v63 = vpop.permute.xlu1 %160  ;;  %v214_v3 = vsel %vm84_vm0, %v341_v61, 0.0 }
 0x127   :  { %346 = vpow2.f32 %v177_v62  ;;  %v168_v4 = vsub.f32 %v439_v10, %v161_v63  ;;  %215 = vadd.xlane.f32.xlu0 %v214_v3  ;;  %v186_v3 = vld [vmem:[#allocation3 + $0x28] sm:$0xff] }
 0x129   :  { %v343_v5 = vpop.eup %342  ;;  %v179_v7 = vmul.f32 1.442695, %v168_v4 }
 0x12a   :  { %v56_v11 = vpop.permute.xlu1 %55  ;;  %v217_v12 = vsel %vm84_vm0, %v343_v5, 0.0 }
 0x12b   :  { %348 = vpow2.f32 %v179_v7  ;;  %218 = vadd.xlane.f32.xlu0 %v217_v12  ;;  %vm72_vm2 = vcmp.eq.s32.totalorder %v50_v14, %v56_v11  ;;  %v248_v7 = vld [vmem:[#allocation4] sm:$0xff] }
 0x12c   :  { %v78_v35 = vsel %vm72_vm2, %v400_v0, 0.0  ;;  %350 = vpow2.f32 %v193_v52 }
 0x12d   :  { %v345_v13 = vpop.eup %344  ;;  %v85_v42 = vsel %vm84_vm0, %v78_v35, 0.0  ;;  %352 = vpow2.f32 %v195_v6 }
 0x12e   :  { %v59_v17 = vpop.permute.xlu1 %58  ;;  %v220_v18 = vsel %vm84_vm0, %v345_v13, 0.0 }
 0x12f   :  { %221 = vadd.xlane.f32.xlu1 %v220_v18  ;;  %vm73_vm3 = vcmp.eq.s32.totalorder %v50_v14, %v59_v17 }
 0x130   :  { %v79_v45 = vsel %vm73_vm3, %v405_v1, 0.0  ;;  %v83_v1 = vsel %vm77_vm7, %v439_v10, 0.0  ;;  %v199_v10 = vmul.f32 1.442695, %v190_v33 }
 0x131   :  { %v347_v25 = vpop.eup %346  ;;  %v88_v0 = vsel %vm84_vm0, %v79_v45, 0.0  ;;  %v100_v51 = vsel %vm84_vm0, %v83_v1, 0.0  ;;  %v252_v45 = vld [vmem:[#allocation4 + $0x20] sm:$0xff] }
 0x132   :  { %v62_v26 = vpop.permute.xlu1 %61  ;;  %v223_v27 = vsel %vm84_vm0, %v347_v25, 0.0  ;;  %v249_v25 = vld [vmem:[#allocation4 + $0x8] sm:$0xff] }
 0x133   :  { %224 = vadd.xlane.f32.xlu0 %v223_v27  ;;  %vm74_vm4 = vcmp.eq.s32.totalorder %v50_v14, %v62_v26  ;;  %v250_v26 = vld [vmem:[#allocation4 + $0x10] sm:$0xff] }
 0x134   :  { %v80_v44 = vsel %vm74_vm4, %v410_v2, 0.0  ;;  %v94_v2 = vsel %vm84_vm0, %v81_v49, 0.0  ;;  %v269_v49 = vld [vmem:[%s633_s2] sm:$0xff] }
 0x135   :  { %v349_v36 = vpop.eup %348  ;;  %v91_v47 = vsel %vm84_vm0, %v80_v44, 0.0  ;;  %v251_v44 = vld [vmem:[#allocation4 + $0x18] sm:$0xff] }
 0x136   :  { %v68_v41 = vpop.permute.xlu1 %67  ;;  %v226_v43 = vsel %vm84_vm0, %v349_v36, 0.0  ;;  %v351_v53 = vpop.eup %350 }
 0x137   :  { %86 = vadd.xlane.f32.xlu0 %v85_v42  ;;  %227 = vadd.xlane.f32.xlu1 %v226_v43  ;;  %vm76_vm6 = vcmp.eq.s32.totalorder %v50_v14, %v68_v41  ;;  %v205_v19 = vmul.f32 %v351_v53, %v181_v54  ;;  %v353_v21 = vpop.eup %352  ;;  %v277_v53 = vld [vmem:[#allocation2 + $0x10] sm:$0xff] }
 0x138   :  { %v82_v48 = vsel %vm76_vm6, %v434_v9, 0.0  ;;  %v197_v9 = vmul.f32 1.442695, %v189_v24  ;;  %v206_v20 = vmul.f32 %v353_v21, %v182_v28 }
 0x139   :  { %v97_v50 = vsel %vm84_vm0, %v82_v48, 0.0 }
 0x13a   :  { %354 = vpow2.f32 %v197_v9 }
 0x13b   :  { %92 = vadd.xlane.f32.xlu0 %v91_v47  ;;  %89 = vadd.xlane.f32.xlu1 %v88_v0  ;;  %356 = vpow2.f32 %v199_v10  ;;  %v253_v10 = vld [vmem:[#allocation4 + $0x28] sm:$0xff] }
 0x13c   :  { %358 = vpow2.f32 %v201_v15  ;;  %v276_v15 = vld [vmem:[#allocation2 + $0x8] sm:$0xff] }
 0x13d   :  { %360 = vpow2.f32 %v203_v16 }
 0x13f   :  { %98 = vadd.xlane.f32.xlu0 %v97_v50  ;;  %95 = vadd.xlane.f32.xlu1 %v94_v2 }
 0x143   :  { %101 = vadd.xlane.f32.xlu1 %v100_v51 }
 0x144   :  { %v355_v22 = vpop.eup %354 }
 0x145   :  { %v207_v30 = vmul.f32 %v355_v22, %v183_v29  ;;  %v357_v37 = vpop.eup %356 }
 0x146   :  { %v208_v31 = vmul.f32 %v357_v37, %v184_v55  ;;  %v359_v38 = vpop.eup %358 }
 0x147   :  { %v209_v61 = vmul.f32 %v359_v38, %v185_v58  ;;  %v361_v62 = vpop.eup %360  ;;  %v272_v38 = vld [vmem:[%s633_s2 + $0x18] sm:$0xff] }
 0x148   :  { %v210_v8 = vmul.f32 %v361_v62, %v186_v3  ;;  %v273_v3 = vld [vmem:[%s633_s2 + $0x20] sm:$0xff] }
 0x1b0   :  { %v213_v23 = vpop.xlane.xlu1 %212 }
 0x1b1   :  { %v229_v32 = vadd.f32 %v213_v23, %v205_v19 }
 0x1b3   :  { %236 = vst.msk [vmem:[#allocation3] sm:$0xff] %vm18_vm1, %v229_v32  ;;  %v270_v32 = vld [vmem:[%s633_s2 + $0x8] sm:$0xff] }
 0x1b4   :  { %v216_v24 = vpop.xlane.xlu0 %215 }
 0x1b5   :  { %v230_v33 = vadd.f32 %v216_v24, %v206_v20  ;;  %v271_v24 = vld [vmem:[%s633_s2 + $0x10] sm:$0xff] }
 0x1b7   :  { %237 = vst.msk [vmem:[#allocation3 + $0x8] sm:$0xff] %vm18_vm1, %v230_v33 }
 0x1b8   :  { %v219_v39 = vpop.xlane.xlu0 %218 }
 0x1b9   :  { %v231_v56 = vadd.f32 %v219_v39, %v207_v30  ;;  %v278_v30 = vld [vmem:[#allocation2 + $0x18] sm:$0xff] }
 0x1ba   :  { %v281_v57 = vld [vmem:[#allocation3] sm:$0xff] }
 0x1bb   :  { %238 = vst.msk [vmem:[#allocation3 + $0x10] sm:$0xff] %vm18_vm1, %v231_v56  ;;  %362 = vlog2.f32 %v281_v57 }
 0x1bc   :  { %v222_v40 = vpop.xlane.xlu1 %221 }
 0x1bd   :  { %v232_v59 = vadd.f32 %v222_v40, %v208_v31 }
 0x1be   :  { %v282_v60 = vld [vmem:[#allocation3 + $0x8] sm:$0xff] }
 0x1bf   :  { %239 = vst.msk [vmem:[#allocation3 + $0x18] sm:$0xff] %vm18_vm1, %v232_v59  ;;  %364 = vlog2.f32 %v282_v60  ;;  %v279_v59 = vld [vmem:[#allocation2 + $0x20] sm:$0xff] }
 0x1c0   :  { %v225_v63 = vpop.xlane.xlu0 %224 }
 0x1c1   :  { %v233_v4 = vadd.f32 %v225_v63, %v209_v61 }
 0x1c2   :  { %v283_v5 = vld [vmem:[#allocation3 + $0x10] sm:$0xff] }
 0x1c3   :  { %366 = vlog2.f32 %v283_v5  ;;  %240 = vst.msk [vmem:[#allocation3 + $0x20] sm:$0xff] %vm18_vm1, %v233_v4 }
 0x1c4   :  { %v228_v11 = vpop.xlane.xlu1 %227  ;;  %v87_v12 = vpop.xlane.xlu0 %86 }
 0x1c5   :  { %v234_v13 = vadd.f32 %v228_v11, %v210_v8  ;;  %v254_v14 = vadd.f32 %v248_v7, %v87_v12  ;;  %v363_v17 = vpop.eup %362  ;;  %v280_v8 = vld [vmem:[#allocation2 + $0x28] sm:$0xff] }
 0x1c6   :  { %v284_v18 = vld [vmem:[#allocation3 + $0x18] sm:$0xff]  ;;  %v288_v35 = vmul.f32 0.6931472, %v363_v17 }
 0x1c7   :  { %368 = vlog2.f32 %v284_v18  ;;  %241 = vst.msk [vmem:[#allocation3 + $0x28] sm:$0xff] %vm18_vm1, %v234_v13  ;;  %260 = vst.msk [vmem:[#allocation4] sm:$0xff] %vm18_vm1, %v254_v14  ;;  %v274_v13 = vld [vmem:[%s633_s2 + $0x28] sm:$0xff] }
 0x1c8   :  { %v90_v27 = vpop.xlane.xlu1 %89  ;;  %v93_v34 = vpop.xlane.xlu0 %92  ;;  %v299_v50 = vadd.f32 %v288_v35, %v275_v46 }
 0x1c9   :  { %v255_v36 = vadd.f32 %v249_v25, %v90_v27  ;;  %v256_v41 = vadd.f32 %v250_v26, %v93_v34  ;;  %v365_v42 = vpop.eup %364 }
 0x1ca   :  { %v285_v43 = vld [vmem:[#allocation3 + $0x20] sm:$0xff]  ;;  %v290_v2 = vmul.f32 0.6931472, %v365_v42 }
 0x1cb   :  { %370 = vlog2.f32 %v285_v43  ;;  %261 = vst.msk [vmem:[#allocation4 + $0x8] sm:$0xff] %vm18_vm1, %v255_v36  ;;  %262 = vst.msk [vmem:[#allocation4 + $0x10] sm:$0xff] %vm18_vm1, %v256_v41 }
 0x1cc   :  { %v96_v47 = vpop.xlane.xlu1 %95  ;;  %v99_v0 = vpop.xlane.xlu0 %98  ;;  %v300_v16 = vadd.f32 %v290_v2, %v276_v15 }
 0x1cd   :  { %v367_v48 = vpop.eup %366  ;;  %v257_v1 = vadd.f32 %v251_v44, %v96_v47  ;;  %v258_v51 = vadd.f32 %v252_v45, %v99_v0 }
 0x1ce   :  { %v286_v52 = vld [vmem:[#allocation3 + $0x28] sm:$0xff]  ;;  %v305_v6 = vld [vmem:[#allocation4] sm:$0xff]  ;;  %v292_v9 = vmul.f32 0.6931472, %v367_v48 }
 0x1cf   :  { %372 = vlog2.f32 %v286_v52  ;;  %v311_v54 = vsub.f32 %v299_v50, %v305_v6  ;;  %263 = vst.msk [vmem:[#allocation4 + $0x18] sm:$0xff] %vm18_vm1, %v257_v1  ;;  %264 = vst.msk [vmem:[#allocation4 + $0x20] sm:$0xff] %vm18_vm1, %v258_v51 }
 0x1d0   :  { %v301_v19 = vadd.f32 %v292_v9, %v277_v53  ;;  %v102_v21 = vpop.xlane.xlu1 %101 }
 0x1d1   :  { %v369_v23 = vpop.eup %368  ;;  %v317_v28 = vmul.f32 %v311_v54, %v269_v49  ;;  %v259_v20 = vadd.f32 %v253_v10, %v102_v21 }
 0x1d2   :  { %v306_v22 = vld [vmem:[#allocation4 + $0x8] sm:$0xff]  ;;  %v307_v29 = vld [vmem:[#allocation4 + $0x10] sm:$0xff]  ;;  %v294_v33 = vmul.f32 0.6931472, %v369_v23 }
 0x1d3   :  { %323 = vst.msk [vmem:[%s634_s3] sm:$0xff] %vm18_vm1, %v317_v28  ;;  %v312_v37 = vsub.f32 %v300_v16, %v306_v22  ;;  %v313_v39 = vsub.f32 %v301_v19, %v307_v29  ;;  %265 = vst.msk [vmem:[#allocation4 + $0x28] sm:$0xff] %vm18_vm1, %v259_v20 }
 0x1d4   :  { %v302_v55 = vadd.f32 %v294_v33, %v278_v30 }
 0x1d5   :  { %v371_v56 = vpop.eup %370  ;;  %v318_v57 = vmul.f32 %v312_v37, %v270_v32  ;;  %v319_v31 = vmul.f32 %v313_v39, %v271_v24 }
 0x1d6   :  { %v308_v40 = vld [vmem:[#allocation4 + $0x18] sm:$0xff]  ;;  %v296_v58 = vmul.f32 0.6931472, %v371_v56  ;;  %v309_v4 = vld [vmem:[#allocation4 + $0x20] sm:$0xff] }
 0x1d7   :  { %324 = vst.msk [vmem:[%s634_s3 + $0x8] sm:$0xff] %vm18_vm1, %v318_v57  ;;  %325 = vst.msk [vmem:[%s634_s3 + $0x10] sm:$0xff] %vm18_vm1, %v319_v31  ;;  %v314_v60 = vsub.f32 %v302_v55, %v308_v40 }
 0x1d8   :  { %v303_v61 = vadd.f32 %v296_v58, %v279_v59 }
 0x1d9   :  { %v373_v62 = vpop.eup %372  ;;  %v320_v63 = vmul.f32 %v314_v60, %v272_v38 }
 0x1da   :  { %v315_v5 = vsub.f32 %v303_v61, %v309_v4  ;;  %v298_v7 = vmul.f32 0.6931472, %v373_v62  ;;  %v310_v14 = vld [vmem:[#allocation4 + $0x28] sm:$0xff] }
 0x1db   :  { %326 = vst.msk [vmem:[%s634_s3 + $0x18] sm:$0xff] %vm18_vm1, %v320_v63 }
 0x1dc   :  { %v321_v11 = vmul.f32 %v315_v5, %v273_v3  ;;  %v304_v12 = vadd.f32 %v298_v7, %v280_v8 }
 0x1de   :  { %327 = vst.msk [vmem:[%s634_s3 + $0x20] sm:$0xff] %vm18_vm1, %v321_v11  ;;  %v316_v17 = vsub.f32 %v304_v12, %v310_v14 }
 0x1e0   :  { %v322_v18 = vmul.f32 %v316_v17, %v274_v13 }
 0x1e2   :  { %328 = vst.msk [vmem:[%s634_s3 + $0x28] sm:$0xff] %vm18_vm1, %v322_v18 }

</bundles_post_ra>
